<compile_context>
chip_gen: v7x
topology: tpu7x:2x2x1
jax: 0.10.0
libtpu: 0.0.40
codegen_flags: <defaults>
</compile_context>

<pallas_src>
import functools

import jax
import jax.numpy as jnp
from jax import lax
from jax.experimental import pallas as pl
from jax.experimental.pallas import tpu as pltpu

IN_EPS = 1e-3                 # InstanceNorm1d(eps=0.001)
BN_EPS = 1e-5                 # SyncBatchNorm default eps
LANE = 128                    # vreg lane width


def _round_up(x, m):
    return ((x + m - 1) // m) * m


def _arch_defaults():
    """(vmem_limit_bytes, n_tile_cap) picked from physical VMEM size."""
    try:
        info = pltpu.get_tpu_info()
        vmem_bytes = int(getattr(info, "vmem_capacity_bytes", 0))
    except Exception:
        vmem_bytes = 0
    if vmem_bytes >= 96 * 1024 * 1024:        # v5e / v6e: 128 MiB physical
        return 64 * 1024 * 1024, 4096
    return 32 * 1024 * 1024, 2048             # v7x (64 MiB) or unknown


def _compiler_params(semantics, vmem_limit):
    return pltpu.CompilerParams(
        dimension_semantics=semantics,
        vmem_limit_bytes=vmem_limit,
    )


def _split_tiles(num_tiles):
    """Split the N-tile axis into (chunks, tiles_per_chunk) for megacore."""
    if num_tiles >= 2 and num_tiles % 2 == 0:
        return 2, num_tiles // 2
    return 1, num_tiles


def _lane_accumulate(v, s, q, lanes=LANE):
    """Accumulate lane-wide partial sum / sumsq of v (C, nt) into (C, lanes)."""
    nt = v.shape[1]
    for j in range(nt // lanes):
        strip = v[:, j * lanes:(j + 1) * lanes]
        s = s + strip
        q = q + strip * strip
    return s, q


# ---------------------------------------------------------------------------
# Pass A: per-(b, c) lane-wide partial sum / sum-of-squares of x.
# ---------------------------------------------------------------------------
def _x_moments_kernel(x_ref, sum_ref, sq_ref):
    nk = pl.program_id(2)

    @pl.when(nk == 0)
    def _():
        sum_ref[...] = jnp.zeros_like(sum_ref)
        sq_ref[...] = jnp.zeros_like(sq_ref)

    x = x_ref[0].astype(jnp.float32)                           # (C, nt)
    s = sum_ref[...][0, 0]                                     # (C, LANE)
    q = sq_ref[...][0, 0]
    s, q = _lane_accumulate(x, s, q)
    sum_ref[...] = s[None, None]
    sq_ref[...] = q[None, None]


def _x_moments(x, n_tile, n_chunks, tiles_per_chunk, vmem_limit):
    B, C, Np = x.shape
    stat = jax.ShapeDtypeStruct((B, n_chunks, C, LANE), jnp.float32)
    stat_spec = pl.BlockSpec((1, 1, C, LANE), lambda b, c, nk: (b, c, 0, 0))
    return pl.pallas_call(
        _x_moments_kernel,
        grid=(B, n_chunks, tiles_per_chunk),
        in_specs=[pl.BlockSpec(
            (1, C, n_tile),
            lambda b, c, nk: (b, 0, c * tiles_per_chunk + nk))],
        out_specs=(stat_spec, stat_spec),
        out_shape=(stat, stat),
        compiler_params=_compiler_params(
            ("parallel", "parallel", "arbitrary"), vmem_limit),
        cost_estimate=pl.CostEstimate(
            flops=3 * B * C * Np,
            transcendentals=0,
            bytes_accessed=B * C * Np * x.dtype.itemsize
                           + 2 * B * n_chunks * C * LANE * 4),
    )(x)


# ---------------------------------------------------------------------------
# Pass B: per-(b, c) lane-wide moments of h1 = conv1(relu(a1 * x + d1)).
# ---------------------------------------------------------------------------
def _h1_moments_kernel(x_ref, a1_ref, d1_ref, w1_ref, b1_ref,
                       sum_ref, sq_ref, *, tiles_per_chunk, n_true, mask_pad):
    nk = pl.program_id(2)

    @pl.when(nk == 0)
    def _():
        sum_ref[...] = jnp.zeros_like(sum_ref)
        sq_ref[...] = jnp.zeros_like(sq_ref)

    x = x_ref[0].astype(jnp.float32)                           # (C, nt)
    t = jnp.maximum(a1_ref[0] * x + d1_ref[0], 0.0)            # fused IN+BN+ReLU
    w = w1_ref[...]                                            # pre-cast f32/bf16
    h = jnp.dot(w, t.astype(w.dtype),
                preferred_element_type=jnp.float32) + b1_ref[...]
    if mask_pad:
        # Zero-padded x columns give a nonzero constant h column; mask them so
        # the h1 moments cover only the true N points.
        nt = h.shape[1]
        col0 = (pl.program_id(1) * tiles_per_chunk + nk) * nt
        lane = lax.broadcasted_iota(jnp.int32, (1, nt), 1)
        h = jnp.where(col0 + lane < n_true, h, 0.0)
    s = sum_ref[...][0, 0]
    q = sq_ref[...][0, 0]
    s, q = _lane_accumulate(h, s, q)
    sum_ref[...] = s[None, None]
    sq_ref[...] = q[None, None]


def _h1_moments(x, a1, d1, w1, b1, n_tile, n_chunks, tiles_per_chunk,
                n_true, mask_pad, vmem_limit):
    B, C, Np = x.shape
    stat = jax.ShapeDtypeStruct((B, n_chunks, C, LANE), jnp.float32)
    stat_spec = pl.BlockSpec((1, 1, C, LANE), lambda b, c, nk: (b, c, 0, 0))
    per_b = pl.BlockSpec((1, C, 1), lambda b, c, nk: (b, 0, 0))
    const2 = lambda b, c, nk: (0, 0)
    return pl.pallas_call(
        functools.partial(_h1_moments_kernel,
                          tiles_per_chunk=tiles_per_chunk,
                          n_true=n_true, mask_pad=mask_pad),
        grid=(B, n_chunks, tiles_per_chunk),
        in_specs=[
            pl.BlockSpec((1, C, n_tile),
                         lambda b, c, nk: (b, 0, c * tiles_per_chunk + nk)),
            per_b, per_b,                                      # a1, d1
            pl.BlockSpec((C, C), const2),                      # w1 (VMEM-resident)
            pl.BlockSpec((C, 1), const2),                      # b1 (VMEM-resident)
        ],
        out_specs=(stat_spec, stat_spec),
        out_shape=(stat, stat),
        compiler_params=_compiler_params(
            ("parallel", "parallel", "arbitrary"), vmem_limit),
        cost_estimate=pl.CostEstimate(
            flops=2 * B * Np * C * C + 8 * B * Np * C,
            transcendentals=0,
            bytes_accessed=B * C * Np * x.dtype.itemsize
                           + C * C * w1.dtype.itemsize
                           + 2 * B * n_chunks * C * LANE * 4),
    )(x, a1, d1, w1, b1)


# ---------------------------------------------------------------------------
# Pass C: out = W2 @ relu(a2 * h1 + d2) + Ws @ x + (b2 + bs)   (two MXU dots,
# single f32 accumulator; no in-kernel concatenate / (2C, nt) copy).
# ---------------------------------------------------------------------------
def _output_kernel(x_ref, a1_ref, d1_ref, w1_ref, b1_ref,
                   a2_ref, d2_ref, w2_ref, ws_ref, bcat_ref, o_ref):
    x = x_ref[0].astype(jnp.float32)                           # (C, nt)
    t1 = jnp.maximum(a1_ref[0] * x + d1_ref[0], 0.0)           # IN+BN+ReLU #1
    w1 = w1_ref[...]
    h1 = jnp.dot(w1, t1.astype(w1.dtype),
                 preferred_element_type=jnp.float32) + b1_ref[...]
    r2 = jnp.maximum(a2_ref[0] * h1 + d2_ref[0], 0.0)          # IN+BN+ReLU #2
    w2 = w2_ref[...]
    ws = ws_ref[...]
    y = (jnp.dot(w2, r2.astype(w2.dtype), preferred_element_type=jnp.float32)
         + jnp.dot(ws, x.astype(ws.dtype), preferred_element_type=jnp.float32)
         + bcat_ref[...])
    o_ref[...] = y[None].astype(o_ref.dtype)


def _output_call(x, a1, d1, w1, b1, a2, d2, w2, ws, bcat,
                 Cout, n_tile, out_dtype, vmem_limit):
    B, C, Np = x.shape
    per_b = pl.BlockSpec((1, C, 1), lambda b, nk: (b, 0, 0))
    const2 = lambda b, nk: (0, 0)
    return pl.pallas_call(
        _output_kernel,
        grid=(B, Np // n_tile),
        in_specs=[
            pl.BlockSpec((1, C, n_tile), lambda b, nk: (b, 0, nk)),  # x tile
            per_b, per_b,                                            # a1, d1
            pl.BlockSpec((C, C), const2),                            # w1
            pl.BlockSpec((C, 1), const2),                            # b1
            per_b, per_b,                                            # a2, d2
            pl.BlockSpec((Cout, C), const2),                         # w2
            pl.BlockSpec((Cout, C), const2),                         # ws
            pl.BlockSpec((Cout, 1), const2),                         # b2 + bs
        ],
        out_specs=pl.BlockSpec((1, Cout, n_tile), lambda b, nk: (b, 0, nk)),
        out_shape=jax.ShapeDtypeStruct((B, Cout, Np), out_dtype),
        compiler_params=_compiler_params(("parallel", "parallel"), vmem_limit),
        cost_estimate=pl.CostEstimate(
            flops=2 * B * Np * C * C + 4 * B * Np * C * Cout + 10 * B * Np * C,
            transcendentals=0,
            bytes_accessed=B * C * Np * x.dtype.itemsize
                           + B * Cout * Np * jnp.dtype(out_dtype).itemsize
                           + (C * C + 2 * C * Cout) * w1.dtype.itemsize),
    )(x, a1, d1, w1, b1, a2, d2, w2, ws, bcat)


# ---------------------------------------------------------------------------
# Glue: collapse IN -> SyncBN into a per-(b, c) affine from one-pass moments.
# ---------------------------------------------------------------------------
def _fused_in_bn_affine(s, sq, n, gamma, beta):
    m = s / n                                                  # (B, C, 1)
    v = jnp.maximum(sq / n - m * m, 0.0)                       # biased variance
    inv = lax.rsqrt(v + IN_EPS)                                # per (b, c)
    # After IN: per-channel batch mean == 0, batch var == mean_b(v/(v+eps)).
    bn_var = jnp.mean(v / (v + IN_EPS), axis=0, keepdims=True)  # (1, C, 1)
    scale_c = gamma.reshape(1, -1, 1) * lax.rsqrt(bn_var + BN_EPS)
    a = inv * scale_c
    d = beta.reshape(1, -1, 1) - m * a
    return a, d


def pointcn_forward(x, params, *, use_bf16_matmul=False, n_tile_cap=None,
                    out_dtype=None):
    """x: (B, C, N) exactly like the PyTorch module.  Returns (B, Cout, N)."""
    B, C, N = x.shape
    Cout = params["w2"].shape[0]
    out_dtype = x.dtype if out_dtype is None else out_dtype

    vmem_limit, cap = _arch_defaults()
    if n_tile_cap is not None:
        cap = max(LANE, (int(n_tile_cap) // LANE) * LANE)

    # Point tile: lane-dense multiple of 128; pad N so every tile is full.
    n_tile = min(cap, _round_up(N, LANE))
    n_padded = _round_up(N, n_tile)
    n_pad = n_padded - N
    x_p = jnp.pad(x, ((0, 0), (0, 0), (0, n_pad))) if n_pad else x

    num_tiles = n_padded // n_tile
    n_chunks, tiles_per_chunk = _split_tiles(num_tiles)

    # Weights: cast once in the wrapper (bf16 MXU operands on v6e/v7x).
    w_dtype = jnp.bfloat16 if use_bf16_matmul else jnp.float32
    w1 = params["w1"].astype(w_dtype)
    b1 = params["b1"].reshape(C, 1).astype(jnp.float32)
    w2 = params["w2"].astype(w_dtype)
    ws = params["ws"].astype(w_dtype)
    bcat = (params["b2"] + params["bs"]).reshape(Cout, 1).astype(jnp.float32)

    # Pass A: moments of x -> fused stage-1 affine (divide by the TRUE N).
    sum_x, sq_x = _x_moments(x_p, n_tile, n_chunks, tiles_per_chunk, vmem_limit)
    sum_x = jnp.sum(sum_x, axis=(1, 3))[..., None]             # (B, C, 1)
    sq_x = jnp.sum(sq_x, axis=(1, 3))[..., None]
    a1, d1 = _fused_in_bn_affine(sum_x, sq_x, N, params["g1"], params["be1"])

    # Pass B: moments of h1 -> fused stage-2 affine.
    sum_h, sq_h = _h1_moments(x_p, a1, d1, w1, b1, n_tile, n_chunks,
                              tiles_per_chunk, N, n_pad > 0, vmem_limit)
    sum_h = jnp.sum(sum_h, axis=(1, 3))[..., None]
    sq_h = jnp.sum(sq_h, axis=(1, 3))[..., None]
    a2, d2 = _fused_in_bn_affine(sum_h, sq_h, N, params["g2"], params["be2"])

    # Pass C: conv2 + shortcut (two dots into one f32 accumulator).
    out = _output_call(x_p, a1, d1, w1, b1, a2, d2, w2, ws, bcat,
                       Cout, n_tile, out_dtype, vmem_limit)
    if n_pad:
        out = out[:, :, :N]
    return out


# ---------------------------------------------------------------------------
# Parameters (PyTorch shapes: Conv1d weight (Cout, Cin), bias (Cout,))
# ---------------------------------------------------------------------------
def init_params(key, C, Cout):
    ks = jax.random.split(key, 10)

    def uni(k, shape, fan_in):
        bound = 1.0 / float(fan_in) ** 0.5
        return jax.random.uniform(k, shape, jnp.float32, -bound, bound)

    return dict(
        g1=1.0 + 0.1 * jax.random.normal(ks[0], (C,), jnp.float32),
        be1=0.1 * jax.random.normal(ks[1], (C,), jnp.float32),
        w1=uni(ks[2], (C, C), C), b1=uni(ks[3], (C,), C),
        g2=1.0 + 0.1 * jax.random.normal(ks[4], (C,), jnp.float32),
        be2=0.1 * jax.random.normal(ks[5], (C,), jnp.float32),
        w2=uni(ks[6], (Cout, C), C), b2=uni(ks[7], (Cout,), C),
        ws=uni(ks[8], (Cout, C), C), bs=uni(ks[9], (Cout,), C),
    )


def pointcn_reference(x, p):
    """Pure-JAX unfused reference in the (B, C, N) layout."""
    def inorm(h):
        m = jnp.mean(h, axis=2, keepdims=True)
        v = jnp.mean((h - m) ** 2, axis=2, keepdims=True)
        return (h - m) * lax.rsqrt(v + IN_EPS)

    def bnorm(h, g, b):
        m = jnp.mean(h, axis=(0, 2), keepdims=True)
        v = jnp.mean((h - m) ** 2, axis=(0, 2), keepdims=True)
        return (h - m) * lax.rsqrt(v + BN_EPS) * g.reshape(1, -1, 1) \
            + b.reshape(1, -1, 1)

    def conv(h, w, b):   # w: (Cout, Cin)
        return jnp.einsum("oc,bcn->bon", w, h,
                          precision=lax.Precision.HIGHEST) + b.reshape(1, -1, 1)

    h = jnp.maximum(bnorm(inorm(x), p["g1"], p["be1"]), 0.0)
    h = conv(h, p["w1"], p["b1"])
    h = jnp.maximum(bnorm(inorm(h), p["g2"], p["be2"]), 0.0)
    h = conv(h, p["w2"], p["b2"])
    return h + conv(x, p["ws"], p["bs"])


if __name__ == "__main__":
    key = jax.random.PRNGKey(0)
    kx, kp, kx2, kp2, kx3, kp3 = jax.random.split(key, 6)

    # 1) Small PyTorch-like shapes (B, C, N) = (2, 4, 16), Cout = 8.
    #    N=16 -> padded to one 128-wide tile; exercises padding + pass-B mask.
    B, C, N, Cout = 2, 4, 16, 8
    x = jax.random.normal(kx, (B, C, N), jnp.float32)
    params = init_params(kp, C, Cout)

    out = jax.block_until_ready(pointcn_forward(x, params))
    ref = pointcn_reference(x, params)
    assert out.shape == (B, Cout, N), out.shape
    err = float(jnp.max(jnp.abs(out - ref)))
    assert err < 1e-3, f"f32 path mismatch vs reference: {err}"

    # 2) bf16 MXU-operand path (weights pre-cast in wrapper), f32 accumulation.
    out_bf16 = jax.block_until_ready(
        pointcn_forward(x, params, use_bf16_matmul=True))
    err_bf16 = float(jnp.max(jnp.abs(out_bf16 - ref)))
    assert err_bf16 < 1e-1, f"bf16 matmul path mismatch vs reference: {err_bf16}"

    # 3) Multi-tile / chunked-stats grid: N = 512 with n_tile forced to 128
    #    (stats grid (2, 2, 2), output grid (2, 4)); verifies global IN/BN
    #    statistics survive tiled + chunked accumulation.
    B2, C2, N2, Cout2 = 2, 8, 512, 8
    x2 = jax.random.normal(kx2, (B2, C2, N2), jnp.float32)
    params2 = init_params(kp2, C2, Cout2)
    out2 = jax.block_until_ready(
        pointcn_forward(x2, params2, n_tile_cap=128))
    ref2 = pointcn_reference(x2, params2)
    err2 = float(jnp.max(jnp.abs(out2 - ref2)))
    assert err2 < 1e-3, f"tiled path mismatch vs reference: {err2}"

    # 4) Ragged N (not a multiple of 128): padded streaming + in-kernel mask.
    B3, C3, N3, Cout3 = 2, 8, 200, 16
    x3 = jax.random.normal(kx3, (B3, C3, N3), jnp.float32)
    params3 = init_params(kp3, C3, Cout3)
    out3 = jax.block_until_ready(
        pointcn_forward(x3, params3, n_tile_cap=128))
    ref3 = pointcn_reference(x3, params3)
    err3 = float(jnp.max(jnp.abs(out3 - ref3)))
    assert err3 < 1e-3, f"ragged-N path mismatch vs reference: {err3}"

    # 5) bf16 HBM I/O path (bf16 x in, bf16 out): loose tolerance.
    x2_bf = x2.astype(jnp.bfloat16)
    out_bf = jax.block_until_ready(
        pointcn_forward(x2_bf, params2, use_bf16_matmul=True))
    assert out_bf.dtype == jnp.bfloat16
    ref_bf = pointcn_reference(x2_bf.astype(jnp.float32), params2)
    err_bf = float(jnp.max(jnp.abs(out_bf.astype(jnp.float32) - ref_bf)))
    assert err_bf < 5e-1, f"bf16 I/O path mismatch vs reference: {err_bf}"

    print("KERNEL_OK")
</pallas_src>

<mosaic_0001>
module attributes {stable_mosaic.version = 11 : i64} {
  func.func @_x_moments_kernel(%arg0: i32, %arg1: i32, %arg2: i32, %arg3: memref<1x4x128xf32, #tpu.memory_space<vmem>>, %arg4: memref<1x1x4x128xf32, #tpu.memory_space<vmem>>, %arg5: memref<1x1x4x128xf32, #tpu.memory_space<vmem>>) attributes {dimension_semantics = [#tpu.dimension_semantics<parallel>, #tpu.dimension_semantics<parallel>, #tpu.dimension_semantics<arbitrary>], iteration_bounds = array<i64: 2, 1, 1>, scalar_prefetch = 0 : i64, scratch_operands = 0 : i64, tpu.core_type = #tpu.core_type<tc>, window_params = [{transform_indices = @transform_0, window_bounds = array<i64: 1, 4, 128>}, {transform_indices = @transform_1, window_bounds = array<i64: 1, 1, 4, 128>}, {transform_indices = @transform_2, window_bounds = array<i64: 1, 1, 4, 128>}]} {
    %c0_i32 = arith.constant 0 : i32
    %0 = arith.cmpi eq, %arg2, %c0_i32 : i32
    %1 = arith.extui %0 : i1 to i32
    %c0_i32_0 = arith.constant 0 : i32
    %2 = arith.cmpi ne, %1, %c0_i32_0 : i32
    scf.if %2 {
      %cst = arith.constant 0.000000e+00 : f32
      %16 = vector.broadcast %cst : f32 to vector<1x1x4x128xf32>
      %c0_19 = arith.constant 0 : index
      %c0_20 = arith.constant 0 : index
      %c0_21 = arith.constant 0 : index
      %c0_22 = arith.constant 0 : index
      %17 = vector.load %arg4[%c0_19, %c0_20, %c0_21, %c0_22] : memref<1x1x4x128xf32, #tpu.memory_space<vmem>>, vector<1x1x4x128xf32>
      tpu.vector_store %arg4[%c0_19, %c0_20, %c0_21, %c0_22], %16 {strides = array<i32>} : memref<1x1x4x128xf32, #tpu.memory_space<vmem>>, vector<1x1x4x128xf32>,
      %cst_23 = arith.constant 0.000000e+00 : f32
      %18 = vector.broadcast %cst_23 : f32 to vector<1x1x4x128xf32>
      %c0_24 = arith.constant 0 : index
      %c0_25 = arith.constant 0 : index
      %c0_26 = arith.constant 0 : index
      %c0_27 = arith.constant 0 : index
      %19 = vector.load %arg5[%c0_24, %c0_25, %c0_26, %c0_27] : memref<1x1x4x128xf32, #tpu.memory_space<vmem>>, vector<1x1x4x128xf32>
      tpu.vector_store %arg5[%c0_24, %c0_25, %c0_26, %c0_27], %18 {strides = array<i32>} : memref<1x1x4x128xf32, #tpu.memory_space<vmem>>, vector<1x1x4x128xf32>,
    } else {
    }
    %c0 = arith.constant 0 : index
    %c0_1 = arith.constant 0 : index
    %c0_2 = arith.constant 0 : index
    %3 = vector.load %arg3[%c0, %c0_1, %c0_2] : memref<1x4x128xf32, #tpu.memory_space<vmem>>, vector<1x4x128xf32>
    %4 = vector.shape_cast %3 : vector<1x4x128xf32> to vector<4x128xf32>
    %c0_3 = arith.constant 0 : index
    %c0_4 = arith.constant 0 : index
    %c0_5 = arith.constant 0 : index
    %c0_6 = arith.constant 0 : index
    %5 = vector.load %arg4[%c0_3, %c0_4, %c0_5, %c0_6] : memref<1x1x4x128xf32, #tpu.memory_space<vmem>>, vector<1x1x4x128xf32>
    %6 = vector.shape_cast %5 : vector<1x1x4x128xf32> to vector<4x128xf32>
    %c0_7 = arith.constant 0 : index
    %c0_8 = arith.constant 0 : index
    %c0_9 = arith.constant 0 : index
    %c0_10 = arith.constant 0 : index
    %7 = vector.load %arg5[%c0_7, %c0_8, %c0_9, %c0_10] : memref<1x1x4x128xf32, #tpu.memory_space<vmem>>, vector<1x1x4x128xf32>
    %8 = vector.shape_cast %7 : vector<1x1x4x128xf32> to vector<4x128xf32>
    %9 = arith.addf %6, %4 : vector<4x128xf32>
    %10 = arith.mulf %4, %4 : vector<4x128xf32>
    %11 = arith.addf %8, %10 : vector<4x128xf32>
    %12 = vector.shape_cast %9 : vector<4x128xf32> to vector<1x1x4x128xf32>
    %c0_11 = arith.constant 0 : index
    %c0_12 = arith.constant 0 : index
    %c0_13 = arith.constant 0 : index
    %c0_14 = arith.constant 0 : index
    %13 = vector.load %arg4[%c0_11, %c0_12, %c0_13, %c0_14] : memref<1x1x4x128xf32, #tpu.memory_space<vmem>>, vector<1x1x4x128xf32>
    tpu.vector_store %arg4[%c0_11, %c0_12, %c0_13, %c0_14], %12 {strides = array<i32>} : memref<1x1x4x128xf32, #tpu.memory_space<vmem>>, vector<1x1x4x128xf32>,
    %14 = vector.shape_cast %11 : vector<4x128xf32> to vector<1x1x4x128xf32>
    %c0_15 = arith.constant 0 : index
    %c0_16 = arith.constant 0 : index
    %c0_17 = arith.constant 0 : index
    %c0_18 = arith.constant 0 : index
    %15 = vector.load %arg5[%c0_15, %c0_16, %c0_17, %c0_18] : memref<1x1x4x128xf32, #tpu.memory_space<vmem>>, vector<1x1x4x128xf32>
    tpu.vector_store %arg5[%c0_15, %c0_16, %c0_17, %c0_18], %14 {strides = array<i32>} : memref<1x1x4x128xf32, #tpu.memory_space<vmem>>, vector<1x1x4x128xf32>,
    return
  }
  func.func @transform_0(%arg0: i32, %arg1: i32, %arg2: i32) -> (i32, i32, i32) {
    %c1_i32 = arith.constant 1 : i32
    %0 = arith.muli %arg1, %c1_i32 : i32
    %1 = arith.addi %0, %arg2 : i32
    %c0_i32 = arith.constant 0 : i32
    %c0_i32_0 = arith.constant 0 : i32
    return %arg0, %c0_i32, %1 : i32, i32, i32
  }
  func.func @transform_1(%arg0: i32, %arg1: i32, %arg2: i32) -> (i32, i32, i32, i32) {
    %c0_i32 = arith.constant 0 : i32
    %c0_i32_0 = arith.constant 0 : i32
    %c0_i32_1 = arith.constant 0 : i32
    return %arg0, %arg1, %c0_i32, %c0_i32_0 : i32, i32, i32, i32
  }
  func.func @transform_2(%arg0: i32, %arg1: i32, %arg2: i32) -> (i32, i32, i32, i32) {
    %c0_i32 = arith.constant 0 : i32
    %c0_i32_0 = arith.constant 0 : i32
    %c0_i32_1 = arith.constant 0 : i32
    return %arg0, %arg1, %c0_i32, %c0_i32_0 : i32, i32, i32, i32
  }
}

</mosaic_0001>

<bundles_post_ra>
// kernel: tpu_custom_call.1
= control target key start
LH: loop header
LB: loop body
LE: loop exit
PB: predicated region body
PF: predicated region fallthrough
CT: control target
= control target key end

     0   :  { %8 = vsyncpa [#allocation3], 0  ;;  %s815_s0 = inlined_call_operand.hbm [shape: f32[2,4,128], index: 0, kind: input, shape index: {}]   ;;  %s816_s1 = inlined_call_operand.hbm [shape: f32[2,1,4,128], index: 1, kind: output, shape index: {0}]   ;;  %s817_s2 = inlined_call_operand.hbm [shape: f32[2,1,4,128], index: 2, kind: output, shape index: {1}]  }
   0x1   :  { %10 = vsyncpa [#allocation3 + $0x1], 0 }
   0x2   :  { %11 = vsyncpa [#allocation4], 0 }
   0x3   :  { %13 = vsyncpa [#allocation4 + $0x1], 0 }
   0x4   :  { %14 = vsyncpa [#allocation7], 0 }
   0x5   :  { %16 = vsyncpa [#allocation7 + $0x1], 0  ;;  %s614_s9 = smov 0   ;;  %s616_s10 = smov 0  }
   0x6   :  { %s618_s11 = smov 0   ;;  %s620_s12 = smov 0  }
   0x7   :  { %s622_s13 = smov 0   ;;  %s624_s14 = smov 0  }
   0x8 LB: > { %s365_s15 = sadd.s32 4294967295, %s593_s14   ;;  %s366_s16 = sadd.s32 4294967294, %s593_s14   ;;  %s593_s14 = sphi %s624_s14, %s22_s14   ;;  %s589_s13 = sphi %s622_s13, %s833_s13   ;;  %s585_s12 = sphi %s620_s12, %s832_s12   ;;  %s581_s11 = sphi %s618_s11, %s831_s11   ;;  %s577_s10 = sphi %s616_s10, %s830_s10   ;;  %s573_s9 = sphi %s614_s9, %s829_s9  }
   0x9   : > { %s41_s17 = sadd.s32 1, %s589_s13  ;;  %s52_s18 = sadd.s32 1, %s581_s11 }
   0xa   : > { %p43_p0 = scmp.ge.s32.totalorder %s41_s17, 2  ;;  %p59_p1 = scmp.ne.s32.totalorder %s581_s11, %s577_s10 }
   0xb   : > { %p60_p2 = scmp.eq.s32.totalorder %s593_s14, 0  ;;  %p65_p3 = scmp.ne.s32.totalorder %s577_s10, %s573_s9 }
   0xc   : > { %s835_s17 = smov (%p43_p0, %s41_s17), 0  ;;  %p66_p5 = scmp.eq.s32.totalorder %s365_s15, 0 }
   0xd   : > { %p655_p4 = por %p60_p2, %p59_p1  ;;  %s47_s20 = ssub.s32 %s589_s13, %s835_s17 }
   0xe   : > { %p91_p6 = scmp.eq.s32.totalorder %s365_s15, 1  ;;  %p50_p7 = scmp.eq.s32.totalorder %s47_s20, 0 }
   0xf   : > { %p661_p8 = por %p66_p5, %p65_p3  ;;  %p97_p10 = scmp.eq.s32.totalorder %s366_s16, 1 }
  0x10   : > { %p665_p9 = por %p91_p6, %p59_p1  ;;  %p398_p13 = scmp.lt.s32.totalorder %s593_s14, 2 }
  0x11   : > { %s670_s23 = scalar_select %p50_p7, %s581_s11, %s52_s18  }
  0x12   : > { %s821_s22 = scalar_select %p665_p9, 1, 0 }
  0x13   : > { %p672_p11 = por %p97_p10, %p65_p3  ;;  %s145_s25 = sand.u32 1, %s581_s11  }
  0x14   : > { %s369_s26 = sshll.u32 %s145_s25, 2  ;;  %s370_s27 = sshll.u32 %s589_s13, 6 }
  0x15   : > { %s822_s24 = scalar_select %p672_p11, 1, 0 }
  0x16   : > { %s683_s30 = scalar_lea.hbm %s815_s0, %s370_s27  ;;  %s149_s3 = scalar_lea.vmem [#allocation2], %s369_s26 }
  0x17   : > { %s158_s4 = sshll.u32 %s149_s3, 4  ;;  %p689_p0 = pnand %p398_p13, %p655_p4  ;;  %s685_s4 = int_to_ptr.vmem [resolvable:$true] %s158_s4 }
  0x18   : > { %s146_s6 = scalar_lea.sflag [#allocation3], %s145_s25  ;;  %s449_s7 = scalar_lea.hbm %s683_s30, 64 }
  0x19   : > { %p450_p3 = scmp.ne.s32.totalorder %s683_s30, %s449_s7  ;;  %p451_p5 = pneg %p689_p0 }
  0x1a   : > { %s454_s16 = scalar_lea.hbm %s815_s0, 128  ;;  %p455_p4 = scmp.lt.u32.totalorder %s683_s30, %s815_s0 }
  0x1b   : > { %p452_p6 = pnand %p451_p5, %p450_p3  ;;  %p456_p10 = scmp.lt.u32.totalorder %s454_s16, %s449_s7 }
  0x1c   : > { %p458_p12 = scmp.lt.u32.totalorder %s449_s7, %s683_s30 }
  0x1d   : > { %p453_p7 = pneg %p452_p6  ;;  %p457_p13 = por %p456_p10, %p455_p4 }
  0x1f   : > { %p459_p1 = por %p458_p12, %p457_p13 }
  0x21   : > { %p460_p2 = pnand %p459_p1, %p453_p7 }
  0x23   : > { %463 = shalt.err (!%p460_p2)
}
  0x24   : > { %s464_s20 = scalar_lea.vmem %s685_s4, 64  ;;  %s595_s25 = smov [#allocation2]  }
  0x25   : > { %p465_p3 = scmp.ne.s32.totalorder %s685_s4, %s464_s20  ;;  %s469_s26 = sshll.u32 %s595_s25, 4  ;;  %s470_s26 = int_to_ptr.vmem [resolvable:$false] %s469_s26 }
  0x26   : > { %s471_s27 = scalar_lea.vmem %s470_s26, 128  ;;  %p472_p9 = scmp.lt.s32.totalorder %s685_s4, %s470_s26 }
  0x27   : > { %p467_p6 = pnand %p465_p3, %p451_p5  ;;  %p473_p4 = scmp.lt.s32.totalorder %s471_s27, %s464_s20 }
  0x29   : > { %p468_p11 = pneg %p467_p6  ;;  %p474_p10 = por %p473_p4, %p472_p9 }
  0x2b   : > { %p475_p12 = pnand %p474_p10, %p468_p11 }
  0x2d   : > { %478 = shalt.err (!%p475_p12)
}
  0x2e   : > { %390 = dma.hbm_to_vmem [thread:$0]  (!%p689_p0), %s683_s30, 64, %s685_s4, %s146_s6  }
  0x2f   : > { %p824_p1 = scmp.lt.s32.totalorder %s593_s14, 3  ;;  %p825_p2 = scmp.ge.s32.totalorder %s593_s14, 1 }
  0x31   : > { %p164_p5 = pnand %p825_p2, %p824_p1 }
  0x32   : > { %s725_s28 = sand.u32 (!%p164_p5), 1, %s577_s10  }
  0x33   : > { %167 = sbr.rel (%p164_p5) target bundleno = 109 (0x6d), region = 24  ;;  %s372_s29 = sshll.u32 (!%p164_p5), %s725_s28, 2 }
  0x34   : > { %s170_s3 = scalar_lea.sflag (!%p164_p5), [#allocation3], %s725_s28  ;;  %s173_s7 = scalar_lea.vmem (!%p164_p5), [#allocation2], %s372_s29 }
  0x3a   : > { %560 = dma.done.wait (%p661_p8), %s170_s3, 64  }
  0x3b   : > { %562 = vsyncadd (%p661_p8), %s170_s3, 4294967232  ;;  %s191_s30 = scalar_lea.vmem [#allocation5], %s372_s29  ;;  %v596_v0 = vmov 0.0   ;;  %s198_s4 = scalar_lea.vmem [#allocation6], %s372_s29  ;;  %v206_v1 = vld [vmem:[%s173_s7] sm:$0xf] }
  0x3c   : > { %204 = vst [vmem:[%s191_s30] sm:$0xf] %v596_v0  ;;  %205 = vst [vmem:[%s198_s4] sm:$0xf] %v596_v0  ;;  %s377_s5 = sshll.u32 %s585_s12, 6  ;;  %s234_s6 = sshll.u32 %s191_s30, 4  ;;  %v210_v4 = vmul.f32 %v206_v1, %v206_v1  ;;  %s739_s6 = int_to_ptr.vmem [resolvable:$true] %s234_s6 }
  0x3d   : > { %s248_s8 = sshll.u32 %s198_s4, 4  ;;  %s737_s21 = scalar_lea.hbm %s816_s1, %s377_s5  ;;  %s746_s8 = int_to_ptr.vmem [resolvable:$true] %s248_s8 }
  0x3e   : > { %s744_s19 = scalar_lea.hbm %s817_s2, %s377_s5  ;;  %s215_s20 = scalar_lea.sflag [#allocation4], %s725_s28 }
  0x3f   : > { %s479_s25 = scalar_lea.vmem %s739_s6, 64  ;;  %p826_p9 = scmp.ne.s32.totalorder %s821_s22, 0 }
  0x40   : > { %p480_p8 = scmp.ne.s32.totalorder %s739_s6, %s479_s25  ;;  %s597_s26 = smov [#allocation5]  }
  0x41   : > { %s483_s27 = sshll.u32 %s597_s26, 4  ;;  %s484_s27 = int_to_ptr.vmem [resolvable:$false] %s483_s27 }
  0x42   : > { %p481_p11 = pnand %p480_p8, %p826_p9  ;;  %s485_s29 = scalar_lea.vmem %s484_s27, 128 }
  0x43   : > { %v207_v2 = vld [vmem:[%s191_s30] sm:$0xf]  ;;  %v208_v3 = vld [vmem:[%s198_s4] sm:$0xf]  ;;  %p486_p7 = scmp.lt.s32.totalorder %s739_s6, %s484_s27  ;;  %p487_p13 = scmp.lt.s32.totalorder %s485_s29, %s479_s25 }
  0x44   : > { %v209_v5 = vadd.f32 %v207_v2, %v206_v1  ;;  %v211_v6 = vadd.f32 %v210_v4, %v208_v3  ;;  %p482_p0 = pneg %p481_p11 }
  0x45   : > { %p488_p3 = por %p487_p13, %p486_p7 }
  0x46   : > { %212 = vst [vmem:[%s191_s30] sm:$0xf] %v209_v5  ;;  %213 = vst [vmem:[%s198_s4] sm:$0xf] %v211_v6 }
  0x47   : > { %p489_p6 = pnand %p488_p3, %p482_p0 }
  0x49   : > { %492 = shalt.err (!%p489_p6)
}
  0x4a   : > { %s493_s3 = scalar_lea.hbm %s737_s21, 64  ;;  %s497_s4 = scalar_lea.hbm %s816_s1, 128 }
  0x4b   : > { %p494_p4 = scmp.ne.s32.totalorder %s737_s21, %s493_s3  ;;  %p498_p1 = scmp.lt.u32.totalorder %s737_s21, %s816_s1 }
  0x4c   : > { %p499_p2 = scmp.lt.u32.totalorder %s497_s4, %s493_s3  ;;  %p501_p8 = scmp.lt.u32.totalorder %s493_s3, %s737_s21 }
  0x4d   : > { %p495_p10 = pnand %p494_p4, %p826_p9 }
  0x4e   : > { %p500_p5 = por %p499_p2, %p498_p1 }
  0x4f   : > { %p496_p12 = pneg %p495_p10 }
  0x50   : > { %p502_p11 = por %p501_p8, %p500_p5 }
  0x52   : > { %p503_p0 = pnand %p502_p11, %p496_p12 }
  0x54   : > { %506 = shalt.err (!%p503_p0)
}
  0x55   : > { %383 = dma.vmem_to_hbm [thread:$0]  (%p826_p9), %s739_s6, 64, %s737_s21, %s215_s20  }
  0x56   : > { %s220_s16 = scalar_lea.sflag [#allocation7], %s725_s28  ;;  %s507_s12 = scalar_lea.vmem %s746_s8, 64 }
  0x57   : > { %p508_p7 = scmp.ne.s32.totalorder %s746_s8, %s507_s12  ;;  %s598_s18 = smov [#allocation6]  }
  0x58   : > { %s511_s25 = sshll.u32 %s598_s18, 4  ;;  %s512_s25 = int_to_ptr.vmem [resolvable:$false] %s511_s25 }
  0x59   : > { %p509_p13 = pnand %p508_p7, %p826_p9  ;;  %s513_s26 = scalar_lea.vmem %s512_s25, 128 }
  0x5a   : > { %p514_p6 = scmp.lt.s32.totalorder %s746_s8, %s512_s25  ;;  %p515_p4 = scmp.lt.s32.totalorder %s513_s26, %s507_s12 }
  0x5b   : > { %p510_p3 = pneg %p509_p13 }
  0x5c   : > { %p516_p10 = por %p515_p4, %p514_p6 }
  0x5e   : > { %p517_p12 = pnand %p516_p10, %p510_p3 }
  0x60   : > { %520 = shalt.err (!%p517_p12)
}
  0x61   : > { %s521_s28 = scalar_lea.hbm %s744_s19, 64  ;;  %s525_s20 = scalar_lea.hbm %s817_s2, 128 }
  0x62   : > { %p522_p1 = scmp.ne.s32.totalorder %s744_s19, %s521_s28  ;;  %p526_p8 = scmp.lt.u32.totalorder %s744_s19, %s817_s2 }
  0x63   : > { %p527_p11 = scmp.lt.u32.totalorder %s525_s20, %s521_s28  ;;  %p529_p7 = scmp.lt.u32.totalorder %s521_s28, %s744_s19 }
  0x64   : > { %p523_p2 = pnand %p522_p1, %p826_p9 }
  0x65   : > { %p528_p0 = por %p527_p11, %p526_p8 }
  0x66   : > { %p524_p5 = pneg %p523_p2 }
  0x67   : > { %p530_p13 = por %p529_p7, %p528_p0 }
  0x69   : > { %p531_p3 = pnand %p530_p13, %p524_p5 }
  0x6b   : > { %534 = shalt.err (!%p531_p3)
}
  0x6c   : > { %384 = dma.vmem_to_hbm [thread:$0]  (%p826_p9), %s746_s8, 64, %s744_s19, %s220_s16  }
  0x6d PF: > { %s260_s3 = sand.u32 1, %s573_s9   ;;  %p827_p6 = scmp.ne.s32.totalorder %s822_s24, 0 }
  0x6e   : > { %p828_p4 = scmp.ge.s32.totalorder %s593_s14, 2  ;;  %s261_s7 = scalar_lea.sflag [#allocation4], %s260_s3 }
  0x70   : > { %p392_p10 = pnand %p828_p4, %p827_p6 }
  0x72   : > { %564 = dma.done.wait (!%p392_p10), %s261_s7, 64  }
  0x73   : > { %566 = vsyncadd (!%p392_p10), %s261_s7, 4294967232  ;;  %s270_s30 = scalar_lea.sflag [#allocation7], %s260_s3 }
  0x74   : > { %568 = dma.done.wait (!%p392_p10), %s270_s30, 64  }
  0x75   : > { %570 = vsyncadd (!%p392_p10), %s270_s30, 4294967232  ;;  %s22_s14 = sadd.s32 1, %s593_s14   ;;  %s829_s9 = smov %s577_s10 }
  0x76   : > { %p19_p12 = scmp.ge.s32.totalorder %s22_s14, 4   ;;  %s830_s10 = smov %s581_s11 }
  0x77   : > { %s831_s11 = smov %s670_s23  ;;  %s832_s12 = smov %s589_s13 }
  0x78   : > { %s833_s13 = smov %s835_s17  ;;  %21 = sbr.rel (!%p19_p12) target bundleno = 8 (0x8), region = 90 }
  0x7f   :  { %275 = vsyncpa [#allocation3], 1 }
  0x80   :  { %277 = vsyncpa [#allocation3 + $0x1], 1 }
  0x81   :  { %278 = vsyncpa [#allocation4], 1 }
  0x82   :  { %280 = vsyncpa [#allocation4 + $0x1], 1 }
  0x83   :  { %281 = vsyncpa [#allocation7], 1 }
  0x84   :  { %283 = vsyncpa [#allocation7 + $0x1], 1 }

</bundles_post_ra>
